<compile_context>
chip_gen: v7x
topology: tpu7x:2x2x1
jax: 0.10.0
libtpu: 0.0.40
codegen_flags: <defaults>
</compile_context>

<pallas_src>
import functools

import jax
import jax.numpy as jnp
from jax.experimental import pallas as pl
from jax.experimental.pallas import tpu as pltpu

LANES = 128


def _round_up(x, m):
    return (x + m - 1) // m * m


def _choose_tm(M, tile_m):
    """Largest divisor of M that is a multiple of 16 and <= tile_m, preferring
    >= 2 grid steps (keeps both v7x TensorCores busy). 0 if none (caller pads)."""
    if M % 16 != 0:
        return 0
    best = 0
    for d in range(16, min(tile_m, M) + 1, 16):
        if M % d == 0 and (M // d >= 2 or best == 0):
            best = d
    return best


# ----------------------------------------------------------------------------
# Pallas kernel: fused DPT-like depth head
#   x:  [TM, K]   bf16   (K = C*P*P)        patch pixels
#   we: [K, Dp]   bf16,  be: [1, Dp]  f32   patch embedding
#   w1: [Dp, Fp]  bf16,  b1: [1, Fp]  f32   MLP up-projection
#   w2: [Fp, Dp]  bf16,  b2: [1, Dp]  f32   MLP down-projection (residual)
#   wh: [Dp, PP]  bf16,  bh: [1, PP]  f32   per-patch depth head (PP = P*P)
#   o:  [TM, PP]  bf16                      lane-dense output (PP % 128 == 0)
# ----------------------------------------------------------------------------
def dpt_head_kernel(x_ref, we_ref, be_ref, w1_ref, b1_ref,
                    w2_ref, b2_ref, wh_ref, bh_ref, o_ref):
    x = x_ref[...]                                              # bf16
    # MXU matmuls on bf16 operands, f32 accumulation; elementwise stays f32.
    h = jnp.dot(x, we_ref[...], preferred_element_type=jnp.float32) + be_ref[...]
    z = jnp.dot(h.astype(jnp.bfloat16), w1_ref[...],
                preferred_element_type=jnp.float32) + b1_ref[...]
    z = jax.nn.gelu(z, approximate=True)
    h = h + jnp.dot(z.astype(jnp.bfloat16), w2_ref[...],
                    preferred_element_type=jnp.float32) + b2_ref[...]
    d = jnp.dot(h.astype(jnp.bfloat16), wh_ref[...],
                preferred_element_type=jnp.float32) + bh_ref[...]
    # ReLU: depth (inverse depth) is non-negative in DPT. bf16 store halves the
    # dominant HBM write stream (depth is min/max-normalized downstream).
    o_ref[...] = jnp.maximum(d, 0.0).astype(o_ref.dtype)


def dpt_depth_forward(imgs, params, *, patch=16, tile_m=1024):
    """imgs: [B, C, H, W] float32 (NCHW, like PyTorch). Returns depth [B, H, W]."""
    B, C, H, W = imgs.shape
    P = patch
    nh, nw = H // P, W // P
    N = nh * nw                       # patches per image
    M = B * N                         # total patch rows
    K = C * P * P
    PP = P * P

    we, be, w1, b1, w2, b2, wh, bh = params
    Dp = we.shape[1]
    Fp = w1.shape[1]
    PPp = wh.shape[1]                 # = PP (256) with default patch=16

    # Patchify (glue, fused by XLA): cast to bf16 FIRST so the transpose stream
    # is half-width, then NCHW -> [M, K].
    x = imgs.astype(jnp.bfloat16).reshape(B, C, nh, P, nw, P)
    x = jnp.transpose(x, (0, 2, 4, 1, 3, 5)).reshape(M, K)

    tm = _choose_tm(M, tile_m)
    if tm:
        M_pad = M                     # no extra pad pass over x
    else:
        tm = min(tile_m, _round_up(M, 16))
        M_pad = _round_up(M, tm)
        x = jnp.pad(x, ((0, M_pad - M), (0, 0)))

    grid = (M_pad // tm,)
    full = lambda shape: pl.BlockSpec(shape, lambda i: (0,) * len(shape))

    out = pl.pallas_call(
        dpt_head_kernel,
        out_shape=jax.ShapeDtypeStruct((M_pad, PPp), jnp.bfloat16),
        grid=grid,
        in_specs=[
            pl.BlockSpec((tm, K), lambda i: (i, 0)),   # patch rows (tiled)
            full((K, Dp)), full((1, Dp)),
            full((Dp, Fp)), full((1, Fp)),
            full((Fp, Dp)), full((1, Dp)),
            full((Dp, PPp)), full((1, PPp)),
        ],
        out_specs=pl.BlockSpec((tm, PPp), lambda i: (i, 0)),
        compiler_params=pltpu.CompilerParams(
            dimension_semantics=("parallel",)),
    )(x, we, be, w1, b1, w2, b2, wh, bh)

    # Un-patchify (glue): [M, PP] -> [B, H, W] f32.
    out = out[:M, :PP].astype(jnp.float32)
    depth = out.reshape(B, nh, nw, P, P)
    depth = jnp.transpose(depth, (0, 1, 3, 2, 4)).reshape(B, H, W)
    return depth


# ----------------------------------------------------------------------------
# Pallas kernels: standardize_depth_map
#   nan_to_num(nan=0.5), per-image min/max over all pixels, normalize.
#   Pass 1: per-image per-lane running min/max over row blocks (accumulator).
#   Pass 2: normalize each row block with the per-image min / exact 1/dist.
#   Row blocks are ~1 MiB so large images respect v7x's 64 MiB VMEM.
# ----------------------------------------------------------------------------
def _minmax_kernel(x_ref, min_ref, max_ref, *, hw, tr):
    r = pl.program_id(1)
    x = x_ref[...]                                              # [1, tr, 128] f32
    x = jnp.where(jnp.isnan(x), jnp.float32(0.5), x)
    row = jax.lax.broadcasted_iota(jnp.int32, x.shape, 1)
    col = jax.lax.broadcasted_iota(jnp.int32, x.shape, 2)
    valid = (r * tr + row) * LANES + col < hw                   # mask padding
    bmin = jnp.min(jnp.where(valid, x, jnp.inf), axis=1, keepdims=True)
    bmax = jnp.max(jnp.where(valid, x, -jnp.inf), axis=1, keepdims=True)

    @pl.when(r == 0)
    def _():
        min_ref[...] = jnp.full_like(min_ref, jnp.inf)
        max_ref[...] = jnp.full_like(max_ref, -jnp.inf)

    min_ref[...] = jnp.minimum(min_ref[...], bmin)
    max_ref[...] = jnp.maximum(max_ref[...], bmax)


def _normalize_kernel(x_ref, min_ref, scale_ref, o_ref):
    x = x_ref[...]
    x = jnp.where(jnp.isnan(x), jnp.float32(0.5), x)
    o_ref[...] = (x - min_ref[...]) * scale_ref[...]


def standardize_depth_map(img, *, tile_rows=2048):
    """img: [B, 1, H, W] (matches the PyTorch method). Returns same shape."""
    B, C, H, W = img.shape
    hw = C * H * W
    R = pl.cdiv(hw, LANES)
    tr = min(tile_rows, _round_up(R, 8))
    R_pad = _round_up(R, tr)
    rb = R_pad // tr

    flat = img.reshape(B, hw).astype(jnp.float32)
    pad = R_pad * LANES - hw
    if pad:
        flat = jnp.pad(flat, ((0, 0), (0, pad)))
    x = flat.reshape(B, R_pad, LANES)

    # Pass 1: per-lane partial min/max per image.
    pmin, pmax = pl.pallas_call(
        functools.partial(_minmax_kernel, hw=hw, tr=tr),
        out_shape=(jax.ShapeDtypeStruct((B, 1, LANES), jnp.float32),
                   jax.ShapeDtypeStruct((B, 1, LANES), jnp.float32)),
        grid=(B, rb),
        in_specs=[pl.BlockSpec((1, tr, LANES), lambda b, r: (b, r, 0))],
        out_specs=(pl.BlockSpec((1, 1, LANES), lambda b, r: (b, 0, 0)),
                   pl.BlockSpec((1, 1, LANES), lambda b, r: (b, 0, 0))),
        compiler_params=pltpu.CompilerParams(
            dimension_semantics=("parallel", "arbitrary")),
    )(x)

    # Tiny per-image finalize in JAX: cross-lane reduce + exact reciprocal.
    mins = jnp.min(pmin.reshape(B, LANES), axis=1)
    maxs = jnp.max(pmax.reshape(B, LANES), axis=1)
    dist = maxs - mins
    scale = 1.0 / jnp.where(dist > 0.0, dist, jnp.float32(1.0))  # guard flat maps
    mins_b = jnp.broadcast_to(mins.reshape(B, 1, 1), (B, 1, LANES))
    scale_b = jnp.broadcast_to(scale.reshape(B, 1, 1), (B, 1, LANES))

    # Pass 2: normalize.
    out = pl.pallas_call(
        _normalize_kernel,
        out_shape=jax.ShapeDtypeStruct((B, R_pad, LANES), jnp.float32),
        grid=(B, rb),
        in_specs=[pl.BlockSpec((1, tr, LANES), lambda b, r: (b, r, 0)),
                  pl.BlockSpec((1, 1, LANES), lambda b, r: (b, 0, 0)),
                  pl.BlockSpec((1, 1, LANES), lambda b, r: (b, 0, 0))],
        out_specs=pl.BlockSpec((1, tr, LANES), lambda b, r: (b, r, 0)),
        compiler_params=pltpu.CompilerParams(
            dimension_semantics=("parallel", "parallel")),
    )(x, mins_b, scale_b)

    return out.reshape(B, R_pad * LANES)[:, :hw].reshape(B, C, H, W)


# ----------------------------------------------------------------------------
# Deterministic parameter initialization (synthetic; no checkpoint load).
# Default dims (dim=128, ffn=256, patch=16) are already 128-multiples, so no
# structurally-zero padding; the pad helper only kicks in for odd configs.
# ----------------------------------------------------------------------------
def init_params(key, *, C=3, patch=16, dim=128, ffn=256):
    K = C * patch * patch
    PP = patch * patch
    Dp, Fp, PPp = _round_up(dim, LANES), _round_up(ffn, LANES), _round_up(PP, LANES)
    ks = jax.random.split(key, 4)
    scale = lambda fan_in: 1.0 / jnp.sqrt(jnp.float32(fan_in))

    def padw(w, shape):
        return jnp.zeros(shape, jnp.float32).at[:w.shape[0], :w.shape[1]].set(w)

    we = padw(jax.random.normal(ks[0], (K, dim), jnp.float32) * scale(K), (K, Dp))
    be = jnp.zeros((1, Dp), jnp.float32)
    w1 = padw(jax.random.normal(ks[1], (dim, ffn), jnp.float32) * scale(dim), (Dp, Fp))
    b1 = jnp.zeros((1, Fp), jnp.float32)
    w2 = padw(jax.random.normal(ks[2], (ffn, dim), jnp.float32) * scale(ffn), (Fp, Dp))
    b2 = jnp.zeros((1, Dp), jnp.float32)
    wh = padw(jax.random.normal(ks[3], (dim, PP), jnp.float32) * scale(dim), (Dp, PPp))
    bh = jnp.zeros((1, PPp), jnp.float32).at[:, :PP].set(0.1)
    return (we.astype(jnp.bfloat16), be,
            w1.astype(jnp.bfloat16), b1,
            w2.astype(jnp.bfloat16), b2,
            wh.astype(jnp.bfloat16), bh)


# ----------------------------------------------------------------------------
# Pure-JAX references (for correctness checks only).
# ----------------------------------------------------------------------------
def _ref_forward(imgs, params, patch):
    B, C, H, W = imgs.shape
    P = patch
    nh, nw = H // P, W // P
    M, K, PP = B * nh * nw, C * P * P, P * P
    we, be, w1, b1, w2, b2, wh, bh = [p.astype(jnp.float32) for p in params]
    x = imgs.reshape(B, C, nh, P, nw, P)
    x = jnp.transpose(x, (0, 2, 4, 1, 3, 5)).reshape(M, K)
    h = x @ we + be
    z = jax.nn.gelu(h @ w1 + b1, approximate=True)
    h = h + z @ w2 + b2
    d = jnp.maximum(h @ wh + bh, 0.0)[:, :PP]
    d = d.reshape(B, nh, nw, P, P)
    return jnp.transpose(d, (0, 1, 3, 2, 4)).reshape(B, H, W)


def _ref_standardize(img):
    img = jnp.nan_to_num(img, nan=0.5)
    flat = img.reshape(img.shape[0], -1)
    maxs = flat.max(axis=1).reshape(-1, 1, 1, 1)
    mins = flat.min(axis=1).reshape(-1, 1, 1, 1)
    dist = jnp.where(maxs - mins > 0, maxs - mins, 1.0)
    return (img - mins) / dist


if __name__ == "__main__":
    key = jax.random.PRNGKey(0)
    k_img, k_par = jax.random.split(key)

    # Small shapes consistent with the module's NCHW image input
    # (image_size=384 in the reference; scaled down to 128 here so the 16x16
    # patch grid stays non-trivial and all tiles stay 128-lane aligned).
    B, C, H, W = 2, 3, 128, 128
    P = 16
    imgs = jax.random.normal(k_img, (B, C, H, W), jnp.float32)
    params = init_params(k_par, C=C, patch=P, dim=128, ffn=256)

    fwd = jax.jit(functools.partial(dpt_depth_forward, patch=P, tile_m=1024))
    depth_maps = jax.block_until_ready(fwd(imgs, params))       # forward(): [B, H, W]
    assert depth_maps.shape == (B, H, W)

    ref = _ref_forward(imgs, params, P)
    rel_err = float(jnp.max(jnp.abs(depth_maps - ref)) / (jnp.max(jnp.abs(ref)) + 1e-6))
    assert rel_err < 5e-2, f"depth head mismatch: rel err {rel_err}"

    # Exercise the module's standardize_depth_map helper (inject a NaN to hit
    # the nan_to_num path).
    dm = depth_maps[:, None, :, :].at[0, 0, 0, 0].set(jnp.nan)
    std = jax.block_until_ready(standardize_depth_map(dm))
    assert std.shape == (B, 1, H, W)
    assert bool(jnp.all(jnp.isfinite(std)))
    std_ref = _ref_standardize(dm)
    assert float(jnp.max(jnp.abs(std - std_ref))) < 1e-4, "standardize mismatch"

    print("KERNEL_OK")
</pallas_src>

<mosaic_0001>
module attributes {stable_mosaic.version = 11 : i64} {
  func.func @dpt_head_kernel(%arg0: i32, %arg1: memref<64x768xbf16, #tpu.memory_space<vmem>>, %arg2: memref<768x128xbf16, #tpu.memory_space<vmem>>, %arg3: memref<1x128xf32, #tpu.memory_space<vmem>>, %arg4: memref<128x256xbf16, #tpu.memory_space<vmem>>, %arg5: memref<1x256xf32, #tpu.memory_space<vmem>>, %arg6: memref<256x128xbf16, #tpu.memory_space<vmem>>, %arg7: memref<1x128xf32, #tpu.memory_space<vmem>>, %arg8: memref<128x256xbf16, #tpu.memory_space<vmem>>, %arg9: memref<1x256xf32, #tpu.memory_space<vmem>>, %arg10: memref<64x256xbf16, #tpu.memory_space<vmem>>) attributes {dimension_semantics = [#tpu.dimension_semantics<parallel>], iteration_bounds = array<i64: 2>, scalar_prefetch = 0 : i64, scratch_operands = 0 : i64, tpu.core_type = #tpu.core_type<tc>, window_params = [{transform_indices = @transform_0, window_bounds = array<i64: 64, 768>}, {pipeline_mode = #tpu.pipeline_mode<synchronous>, transform_indices = @transform_1, window_bounds = array<i64: 768, 128>}, {pipeline_mode = #tpu.pipeline_mode<synchronous>, transform_indices = @transform_2, window_bounds = array<i64: 1, 128>}, {pipeline_mode = #tpu.pipeline_mode<synchronous>, transform_indices = @transform_3, window_bounds = array<i64: 128, 256>}, {pipeline_mode = #tpu.pipeline_mode<synchronous>, transform_indices = @transform_4, window_bounds = array<i64: 1, 256>}, {pipeline_mode = #tpu.pipeline_mode<synchronous>, transform_indices = @transform_5, window_bounds = array<i64: 256, 128>}, {pipeline_mode = #tpu.pipeline_mode<synchronous>, transform_indices = @transform_6, window_bounds = array<i64: 1, 128>}, {pipeline_mode = #tpu.pipeline_mode<synchronous>, transform_indices = @transform_7, window_bounds = array<i64: 128, 256>}, {pipeline_mode = #tpu.pipeline_mode<synchronous>, transform_indices = @transform_8, window_bounds = array<i64: 1, 256>}, {transform_indices = @transform_9, window_bounds = array<i64: 64, 256>}]} {
    %c0 = arith.constant 0 : index
    %c0_0 = arith.constant 0 : index
    %0 = vector.load %arg1[%c0, %c0_0] : memref<64x768xbf16, #tpu.memory_space<vmem>>, vector<64x768xbf16>
    %c0_1 = arith.constant 0 : index
    %c0_2 = arith.constant 0 : index
    %1 = vector.load %arg2[%c0_1, %c0_2] : memref<768x128xbf16, #tpu.memory_space<vmem>>, vector<768x128xbf16>
    %cst = arith.constant dense<0.000000e+00> : vector<64x128xf32>
    %2 = tpu.matmul %0, %1, %cst {dimension_numbers = #tpu.dot_dimension_numbers<[1], [0], [0], [1], [0, 0, 1, 1], [], []>} : vector<64x768xbf16>, vector<768x128xbf16>, vector<64x128xf32> -> vector<64x128xf32>
    %c0_3 = arith.constant 0 : index
    %c0_4 = arith.constant 0 : index
    %3 = vector.load %arg3[%c0_3, %c0_4] : memref<1x128xf32, #tpu.memory_space<vmem>>, vector<1x128xf32>
    %4 = vector.broadcast %3 : vector<1x128xf32> to vector<64x128xf32>
    %5 = arith.addf %2, %4 : vector<64x128xf32>
    %6 = arith.truncf %5 : vector<64x128xf32> to vector<64x128xbf16>
    %c0_5 = arith.constant 0 : index
    %c0_6 = arith.constant 0 : index
    %7 = vector.load %arg4[%c0_5, %c0_6] : memref<128x256xbf16, #tpu.memory_space<vmem>>, vector<128x256xbf16>
    %cst_7 = arith.constant dense<0.000000e+00> : vector<64x256xf32>
    %8 = tpu.matmul %6, %7, %cst_7 {dimension_numbers = #tpu.dot_dimension_numbers<[1], [0], [0], [1], [0, 0, 1, 1], [], []>} : vector<64x128xbf16>, vector<128x256xbf16>, vector<64x256xf32> -> vector<64x256xf32>
    %c0_8 = arith.constant 0 : index
    %c0_9 = arith.constant 0 : index
    %9 = vector.load %arg5[%c0_8, %c0_9] : memref<1x256xf32, #tpu.memory_space<vmem>>, vector<1x256xf32>
    %10 = vector.broadcast %9 : vector<1x256xf32> to vector<64x256xf32>
    %11 = arith.addf %8, %10 : vector<64x256xf32>
    %12 = arith.mulf %11, %11 : vector<64x256xf32>
    %13 = arith.mulf %11, %12 : vector<64x256xf32>
    %cst_10 = arith.constant 4.471500e-02 : f32
    %14 = vector.broadcast %cst_10 : f32 to vector<64x256xf32>
    %15 = arith.mulf %14, %13 : vector<64x256xf32>
    %16 = arith.addf %11, %15 : vector<64x256xf32>
    %cst_11 = arith.constant 0.797884583 : f32
    %17 = vector.broadcast %cst_11 : f32 to vector<64x256xf32>
    %18 = arith.mulf %17, %16 : vector<64x256xf32>
    %19 = math.tanh %18 : vector<64x256xf32>
    %cst_12 = arith.constant 1.000000e+00 : f32
    %20 = vector.broadcast %cst_12 : f32 to vector<64x256xf32>
    %21 = arith.addf %20, %19 : vector<64x256xf32>
    %cst_13 = arith.constant 5.000000e-01 : f32
    %22 = vector.broadcast %cst_13 : f32 to vector<64x256xf32>
    %23 = arith.mulf %22, %21 : vector<64x256xf32>
    %24 = arith.mulf %11, %23 : vector<64x256xf32>
    %25 = arith.truncf %24 : vector<64x256xf32> to vector<64x256xbf16>
    %c0_14 = arith.constant 0 : index
    %c0_15 = arith.constant 0 : index
    %26 = vector.load %arg6[%c0_14, %c0_15] : memref<256x128xbf16, #tpu.memory_space<vmem>>, vector<256x128xbf16>
    %cst_16 = arith.constant dense<0.000000e+00> : vector<64x128xf32>
    %27 = tpu.matmul %25, %26, %cst_16 {dimension_numbers = #tpu.dot_dimension_numbers<[1], [0], [0], [1], [0, 0, 1, 1], [], []>} : vector<64x256xbf16>, vector<256x128xbf16>, vector<64x128xf32> -> vector<64x128xf32>
    %28 = arith.addf %5, %27 : vector<64x128xf32>
    %c0_17 = arith.constant 0 : index
    %c0_18 = arith.constant 0 : index
    %29 = vector.load %arg7[%c0_17, %c0_18] : memref<1x128xf32, #tpu.memory_space<vmem>>, vector<1x128xf32>
    %30 = vector.broadcast %29 : vector<1x128xf32> to vector<64x128xf32>
    %31 = arith.addf %28, %30 : vector<64x128xf32>
    %32 = arith.truncf %31 : vector<64x128xf32> to vector<64x128xbf16>
    %c0_19 = arith.constant 0 : index
    %c0_20 = arith.constant 0 : index
    %33 = vector.load %arg8[%c0_19, %c0_20] : memref<128x256xbf16, #tpu.memory_space<vmem>>, vector<128x256xbf16>
    %cst_21 = arith.constant dense<0.000000e+00> : vector<64x256xf32>
    %34 = tpu.matmul %32, %33, %cst_21 {dimension_numbers = #tpu.dot_dimension_numbers<[1], [0], [0], [1], [0, 0, 1, 1], [], []>} : vector<64x128xbf16>, vector<128x256xbf16>, vector<64x256xf32> -> vector<64x256xf32>
    %c0_22 = arith.constant 0 : index
    %c0_23 = arith.constant 0 : index
    %35 = vector.load %arg9[%c0_22, %c0_23] : memref<1x256xf32, #tpu.memory_space<vmem>>, vector<1x256xf32>
    %36 = vector.broadcast %35 : vector<1x256xf32> to vector<64x256xf32>
    %37 = arith.addf %34, %36 : vector<64x256xf32>
    %cst_24 = arith.constant 0.000000e+00 : f32
    %38 = vector.broadcast %cst_24 : f32 to vector<64x256xf32>
    %39 = arith.maximumf %37, %38 : vector<64x256xf32>
    %40 = arith.truncf %39 : vector<64x256xf32> to vector<64x256xbf16>
    %c0_25 = arith.constant 0 : index
    %c0_26 = arith.constant 0 : index
    %41 = vector.load %arg10[%c0_25, %c0_26] : memref<64x256xbf16, #tpu.memory_space<vmem>>, vector<64x256xbf16>
    tpu.vector_store %arg10[%c0_25, %c0_26], %40 {strides = array<i32>} : memref<64x256xbf16, #tpu.memory_space<vmem>>, vector<64x256xbf16>,
    return
  }
  func.func @transform_0(%arg0: i32) -> (i32, i32) {
    %c0_i32 = arith.constant 0 : i32
    %c0_i32_0 = arith.constant 0 : i32
    return %arg0, %c0_i32 : i32, i32
  }
  func.func @transform_1(%arg0: i32) -> (i32, i32) {
    %c0_i32 = arith.constant 0 : i32
    %c0_i32_0 = arith.constant 0 : i32
    %c0_i32_1 = arith.constant 0 : i32
    return %c0_i32, %c0_i32_0 : i32, i32
  }
  func.func @transform_2(%arg0: i32) -> (i32, i32) {
    %c0_i32 = arith.constant 0 : i32
    %c0_i32_0 = arith.constant 0 : i32
    %c0_i32_1 = arith.constant 0 : i32
    return %c0_i32, %c0_i32_0 : i32, i32
  }
  func.func @transform_3(%arg0: i32) -> (i32, i32) {
    %c0_i32 = arith.constant 0 : i32
    %c0_i32_0 = arith.constant 0 : i32
    %c0_i32_1 = arith.constant 0 : i32
    return %c0_i32, %c0_i32_0 : i32, i32
  }
  func.func @transform_4(%arg0: i32) -> (i32, i32) {
    %c0_i32 = arith.constant 0 : i32
    %c0_i32_0 = arith.constant 0 : i32
    %c0_i32_1 = arith.constant 0 : i32
    return %c0_i32, %c0_i32_0 : i32, i32
  }
  func.func @transform_5(%arg0: i32) -> (i32, i32) {
    %c0_i32 = arith.constant 0 : i32
    %c0_i32_0 = arith.constant 0 : i32
    %c0_i32_1 = arith.constant 0 : i32
    return %c0_i32, %c0_i32_0 : i32, i32
  }
  func.func @transform_6(%arg0: i32) -> (i32, i32) {
    %c0_i32 = arith.constant 0 : i32
    %c0_i32_0 = arith.constant 0 : i32
    %c0_i32_1 = arith.constant 0 : i32
    return %c0_i32, %c0_i32_0 : i32, i32
  }
  func.func @transform_7(%arg0: i32) -> (i32, i32) {
    %c0_i32 = arith.constant 0 : i32
    %c0_i32_0 = arith.constant 0 : i32
    %c0_i32_1 = arith.constant 0 : i32
    return %c0_i32, %c0_i32_0 : i32, i32
  }
  func.func @transform_8(%arg0: i32) -> (i32, i32) {
    %c0_i32 = arith.constant 0 : i32
    %c0_i32_0 = arith.constant 0 : i32
    %c0_i32_1 = arith.constant 0 : i32
    return %c0_i32, %c0_i32_0 : i32, i32
  }
  func.func @transform_9(%arg0: i32) -> (i32, i32) {
    %c0_i32 = arith.constant 0 : i32
    %c0_i32_0 = arith.constant 0 : i32
    return %arg0, %c0_i32 : i32, i32
  }
}

</mosaic_0001>

<bundles_post_ra>
// kernel: dpt_depth_forward.1
= control target key start
LH: loop header
LB: loop body
LE: loop exit
PB: predicated region body
PF: predicated region fallthrough
CT: control target
= control target key end

     0   :  { %s2500_s30 = smov 0   ;;  %s3043_s0 = inlined_call_operand.vmem [shape: bf16[128,768], index: 0, kind: input, shape index: {}]   ;;  %s3044_s1 = inlined_call_operand.vmem [shape: bf16[768,128], index: 1, kind: input, shape index: {}]   ;;  %s3045_s2 = inlined_call_operand.vmem [shape: f32[1,128], index: 2, kind: input, shape index: {}]   ;;  %s3046_s3 = inlined_call_operand.vmem [shape: bf16[128,256], index: 3, kind: input, shape index: {}]   ;;  %s3047_s4 = inlined_call_operand.vmem [shape: f32[1,256], index: 4, kind: input, shape index: {}]   ;;  %s3048_s5 = inlined_call_operand.vmem [shape: bf16[256,128], index: 5, kind: input, shape index: {}]   ;;  %s3049_s6 = inlined_call_operand.vmem [shape: f32[1,128], index: 6, kind: input, shape index: {}]   ;;  %s3050_s7 = inlined_call_operand.vmem [shape: bf16[128,256], index: 7, kind: input, shape index: {}]   ;;  %s3051_s8 = inlined_call_operand.vmem [shape: f32[1,256], index: 8, kind: input, shape index: {}]   ;;  %s3052_s9 = inlined_call_operand.vmem [shape: bf16[128,256], index: 9, kind: output, shape index: {}]  }
   0x1 LB: > { %s1940_s10 = sadd.s32 4294967295, %s2447_s30   ;;  %p1944_p0 = scmp.ge.s32.totalorder %s2447_s30, 1  ;;  %s2447_s30 = sphi %s2500_s30, %s19_s30  }
   0x2   : > { %p289_p1 = scmp.lt.s32.totalorder %s2447_s30, 3 }
   0x4   : > { %p290_p2 = pnand %p1944_p0, %p289_p1 }
   0x5   : > { %v2261_v0 = vld [vmem:[%s3044_s1 + $0x40] sm:$0xff] (!%p290_p2)   ;;  %v2265_v4 = vld [vmem:[%s3044_s1 + $0x48] sm:$0xff] (!%p290_p2)   ;;  %v2269_v8 = vld [vmem:[%s3044_s1 + $0x50] sm:$0xff] (!%p290_p2)   ;;  %s1945_s20 = sshll.u32 (!%p290_p2), %s1940_s10, 3 }
   0x6   : > { %293 = sbr.rel (%p290_p2) target bundleno = 1012 (0x3f4), region = 56  ;;  %v2262_v1 = vld [vmem:[%s3044_s1] sm:$0xff] (!%p290_p2)   ;;  %2091 = vmatprep.subr.bf16.mxu0 (!%p290_p2), %v2261_v0  ;;  %v2266_v5 = vld [vmem:[%s3044_s1 + $0x8] sm:$0xff] (!%p290_p2)   ;;  %v2270_v9 = vld [vmem:[%s3044_s1 + $0x10] sm:$0xff] (!%p290_p2)   ;;  %p328_p3 = scmp.lt.s32.totalorder (!%p290_p2), %s1945_s20, 15 }
   0x7   : > { %v2263_v2 = vld [vmem:[%s3044_s1 + $0xc0] sm:$0xff] (!%p290_p2)   ;;  %2092 = vmatpush3.bf16.msra.mxu0 (!%p290_p2), %v2262_v1  ;;  %v2267_v6 = vld [vmem:[%s3044_s1 + $0xc8] sm:$0xff] (!%p290_p2)   ;;  %v2271_v10 = vld [vmem:[%s3044_s1 + $0xd0] sm:$0xff] (!%p290_p2)  }
   0x8   : > { %v2264_v3 = vld [vmem:[%s3044_s1 + $0x80] sm:$0xff] (!%p290_p2)   ;;  %2131 = vmatprep.subr.bf16.mxu1 (!%p290_p2), %v2263_v2  ;;  %2093 = vmatprep.subr.bf16.mxu0 (!%p290_p2), %v2265_v4  ;;  %v2268_v7 = vld [vmem:[%s3044_s1 + $0x88] sm:$0xff] (!%p290_p2)   ;;  %v2272_v11 = vld [vmem:[%s3044_s1 + $0x90] sm:$0xff] (!%p290_p2)  }
   0x9   : > { %2132 = vmatpush3.bf16.msra.mxu1 (!%p290_p2), %v2264_v3  ;;  %v2273_v12 = vld [vmem:[%s3044_s1 + $0x58] sm:$0xff] (!%p290_p2)   ;;  %v2277_v16 = vld [vmem:[%s3044_s1 + $0x60] sm:$0xff] (!%p290_p2)   ;;  %v2281_v20 = vld [vmem:[%s3044_s1 + $0x68] sm:$0xff] (!%p290_p2)  }
   0xa   : > { %2133 = vmatprep.subr.bf16.mxu1 (!%p290_p2), %v2267_v6  ;;  %v2274_v13 = vld [vmem:[%s3044_s1 + $0x18] sm:$0xff] (!%p290_p2)   ;;  %v2278_v17 = vld [vmem:[%s3044_s1 + $0x20] sm:$0xff] (!%p290_p2)   ;;  %v2282_v21 = vld [vmem:[%s3044_s1 + $0x28] sm:$0xff] (!%p290_p2)  }
   0xb   : > { %2094 = vmatpush3.bf16.msra.mxu0 (!%p290_p2), %v2266_v5  ;;  %v2275_v14 = vld [vmem:[%s3044_s1 + $0xd8] sm:$0xff] (!%p290_p2)   ;;  %v2279_v18 = vld [vmem:[%s3044_s1 + $0xe0] sm:$0xff] (!%p290_p2)   ;;  %v2283_v22 = vld [vmem:[%s3044_s1 + $0xe8] sm:$0xff] (!%p290_p2)  }
   0xc   : > { %2095 = vmatprep.subr.bf16.mxu0 (!%p290_p2), %v2269_v8  ;;  %v2276_v15 = vld [vmem:[%s3044_s1 + $0x98] sm:$0xff] (!%p290_p2)   ;;  %v2280_v19 = vld [vmem:[%s3044_s1 + $0xa0] sm:$0xff] (!%p290_p2)   ;;  %v2284_v23 = vld [vmem:[%s3044_s1 + $0xa8] sm:$0xff] (!%p290_p2)  }
   0xd   : > { %2134 = vmatpush3.bf16.msra.mxu1 %v2268_v7  ;;  %s3054_s20 = smov (!%p328_p3, %s1945_s20), 15  ;;  %v2285_v24 = vld [vmem:[%s3044_s1 + $0x70] sm:$0xff]   ;;  %v2289_v28 = vld [vmem:[%s3044_s1 + $0x78] sm:$0xff]   ;;  %v2296_v34 = vld [vmem:[%s3044_s1 + $0x140] sm:$0xff]  }
   0xe   : > { %2135 = vmatprep.subr.bf16.mxu1 %v2271_v10  ;;  %s2251_s24 = smul.u32 24, %s3054_s20  ;;  %v2286_v25 = vld [vmem:[%s3044_s1 + $0x30] sm:$0xff]   ;;  %v2290_v29 = vld [vmem:[%s3044_s1 + $0x38] sm:$0xff]   ;;  %v2300_v37 = vld [vmem:[%s3044_s1 + $0x100] sm:$0xff]   ;;  %s2082_s27 = sshll.u32 %s3054_s20, 3 }
   0xf   : > { %2096 = vmatpush3.bf16.msra.mxu0 %v2270_v9  ;;  %v2287_v26 = vld [vmem:[%s3044_s1 + $0xf0] sm:$0xff]   ;;  %v2291_v30 = vld [vmem:[%s3044_s1 + $0xf8] sm:$0xff]   ;;  %v2301_v38 = vld [vmem:[%s3044_s1 + $0x148] sm:$0xff]   ;;  %s3030_s29 = scalar_lea.vmem %s3052_s9, %s2082_s27 }
  0x10   : > { %2097 = vmatprep.subr.bf16.mxu0 %v2273_v12  ;;  %v2288_v27 = vld [vmem:[%s3044_s1 + $0xb0] sm:$0xff]   ;;  %s2603_s15 = scalar_lea.vmem %s3043_s0, %s2251_s24  ;;  %v2295_v33 = vld [vmem:[%s3044_s1 + $0xb8] sm:$0xff]   ;;  %v2302_v39 = vld [vmem:[%s3044_s1 + $0x108] sm:$0xff]  }
  0x11   : > { %2136 = vmatpush3.bf16.msra.mxu1 %v2272_v11  ;;  %v2292_v31 = vld [vmem:[%s2603_s15] ss:$24 sps:$4 sm:$0xff]   ;;  %v2294_v32 = vld [vmem:[%s2603_s15 + $0x4] ss:$24 sps:$4 sm:$0xff]   ;;  %v2303_v40 = vld [vmem:[%s2603_s15 + $0x34] ss:$24 sps:$4 sm:$0xff]  }
  0x12   : > { %2137 = vmatprep.subr.bf16.mxu1 %v2275_v14  ;;  %909 = vmatprep.mubr.bf16.mxu0 %v2294_v32  ;;  %v2297_v35 = vld [vmem:[%s2603_s15 + $0x8] ss:$24 sps:$4 sm:$0xff]   ;;  %v2299_v36 = vld [vmem:[%s2603_s15 + $0xc] ss:$24 sps:$4 sm:$0xff]   ;;  %v2306_v42 = vld [vmem:[%s3044_s1 + $0x150] sm:$0xff]  }
  0x13   : > { %2098 = vmatpush3.bf16.msra.mxu0 %v2274_v13  ;;  %974 = vmatprep.mubr.bf16.mxu1 %v2299_v36  ;;  %v2305_v41 = vld [vmem:[%s2603_s15 + $0x30] ss:$24 sps:$4 sm:$0xff]   ;;  %v2307_v43 = vld [vmem:[%s2603_s15 + $0x3c] ss:$24 sps:$4 sm:$0xff]   ;;  %v2315_v49 = vld [vmem:[%s2603_s15 + $0x60] ss:$24 sps:$4 sm:$0xff]  }
  0x14   : > { %2099 = vmatprep.subr.bf16.mxu0 %v2277_v16  ;;  %v2309_v44 = vld [vmem:[%s3044_s1 + $0x110] sm:$0xff]   ;;  %v2311_v46 = vld [vmem:[%s3044_s1 + $0x158] sm:$0xff]   ;;  %v2316_v50 = vld [vmem:[%s3044_s1 + $0x160] sm:$0xff]  }
  0x15   : > { %2138 = vmatpush3.bf16.msra.mxu1 %v2276_v15  ;;  %v2310_v45 = vld [vmem:[%s2603_s15 + $0x38] ss:$24 sps:$4 sm:$0xff]   ;;  %v2313_v48 = vld [vmem:[%s2603_s15 + $0x64] ss:$24 sps:$4 sm:$0xff]   ;;  %v2320_v53 = vld [vmem:[%s2603_s15 + $0x68] ss:$24 sps:$4 sm:$0xff]  }
  0x16   : > { %2139 = vmatprep.subr.bf16.mxu1 %v2279_v18  ;;  %v2312_v47 = vld [vmem:[%s3044_s1 + $0x118] sm:$0xff]   ;;  %v2317_v51 = vld [vmem:[%s2603_s15 + $0x6c] ss:$24 sps:$4 sm:$0xff]   ;;  %v2325_v57 = vld [vmem:[%s2603_s15 + $0x90] ss:$24 sps:$4 sm:$0xff]  }
  0x17   : > { %2100 = vmatpush3.bf16.msra.mxu0 %v2278_v17  ;;  %v2319_v52 = vld [vmem:[%s3044_s1 + $0x120] sm:$0xff]   ;;  %v2321_v54 = vld [vmem:[%s3044_s1 + $0x168] sm:$0xff]   ;;  %v2326_v58 = vld [vmem:[%s3044_s1 + $0x170] sm:$0xff]  }
  0x18   : > { %2101 = vmatprep.subr.bf16.mxu0 %v2281_v20  ;;  %v2322_v55 = vld [vmem:[%s3044_s1 + $0x128] sm:$0xff]   ;;  %v2327_v59 = vld [vmem:[%s2603_s15 + $0x9c] ss:$24 sps:$4 sm:$0xff]   ;;  %v2330_v61 = vld [vmem:[%s2603_s15 + $0x98] ss:$24 sps:$4 sm:$0xff]  }
  0x19   : > { %2140 = vmatpush3.bf16.msra.mxu1 %v2280_v19  ;;  %v2323_v56 = vld [vmem:[%s2603_s15 + $0x94] ss:$24 sps:$4 sm:$0xff]   ;;  %v2331_v62 = vld [vmem:[%s3044_s1 + $0x178] sm:$0xff]   ;;  %v2333_v1 = vld [vmem:[%s2603_s15 + $0x10] ss:$24 sps:$4 sm:$0xff]  }
  0x1a   : > { %2141 = vmatprep.subr.bf16.mxu1 %v2283_v22  ;;  %v2329_v60 = vld [vmem:[%s3044_s1 + $0x130] sm:$0xff]   ;;  %v2332_v0 = vld [vmem:[%s3044_s1 + $0x138] sm:$0xff]   ;;  %v2347_v8 = vld [vmem:[%s3046_s3 + $0x4] ss:$8 sps:$4 sm:$0xff]  }
  0x1b   : > { %2102 = vmatpush3.bf16.msra.mxu0 %v2282_v21  ;;  %v2335_v63 = vld [vmem:[%s2603_s15 + $0x14] ss:$24 sps:$4 sm:$0xff]   ;;  %v2336_v2 = vld [vmem:[%s2603_s15 + $0x44] ss:$24 sps:$4 sm:$0xff]   ;;  %v2338_v3 = vld [vmem:[%s2603_s15 + $0x40] ss:$24 sps:$4 sm:$0xff]  }
  0x1c   : > { %2103 = vmatprep.subr.bf16.mxu0 %v2285_v24  ;;  %v2339_v4 = vld [vmem:[%s2603_s15 + $0x74] ss:$24 sps:$4 sm:$0xff]   ;;  %v2341_v5 = vld [vmem:[%s2603_s15 + $0x70] ss:$24 sps:$4 sm:$0xff]   ;;  %v2342_v6 = vld [vmem:[%s2603_s15 + $0xa4] ss:$24 sps:$4 sm:$0xff]  }
  0x1d   : > { %2142 = vmatpush3.bf16.msra.mxu1 %v2284_v23  ;;  %v2344_v7 = vld [vmem:[%s2603_s15 + $0xa0] ss:$24 sps:$4 sm:$0xff]   ;;  %v2350_v10 = vld [vmem:[%s3046_s3 + $0x14] ss:$8 sps:$4 sm:$0xff]   ;;  %v2353_v12 = vld [vmem:[%s3046_s3 + $0x24] ss:$8 sps:$4 sm:$0xff]  }
  0x1e   : > { %2143 = vmatprep.subr.bf16.mxu1 %v2287_v26  ;;  %v2345_v9 = vld [vmem:[%s3046_s3] ss:$8 sps:$4 sm:$0xff]   ;;  %v2348_v11 = vld [vmem:[%s3046_s3 + $0x10] ss:$8 sps:$4 sm:$0xff]   ;;  %v2356_v14 = vld [vmem:[%s3046_s3 + $0x34] ss:$8 sps:$4 sm:$0xff]  }
  0x1f   : > { %2104 = vmatpush3.bf16.msra.mxu0 %v2286_v25  ;;  %v2351_v13 = vld [vmem:[%s3046_s3 + $0x20] ss:$8 sps:$4 sm:$0xff]   ;;  %v2354_v15 = vld [vmem:[%s3046_s3 + $0x30] ss:$8 sps:$4 sm:$0xff]   ;;  %v2359_v16 = vld [vmem:[%s3046_s3 + $0x44] ss:$8 sps:$4 sm:$0xff]  }
  0x20   : > { %2105 = vmatprep.subr.bf16.mxu0 %v2289_v28  ;;  %v2357_v17 = vld [vmem:[%s3046_s3 + $0x40] ss:$8 sps:$4 sm:$0xff]   ;;  %v2362_v18 = vld [vmem:[%s3046_s3 + $0x54] ss:$8 sps:$4 sm:$0xff]   ;;  %v2360_v19 = vld [vmem:[%s3046_s3 + $0x50] ss:$8 sps:$4 sm:$0xff]  }
  0x21   : > { %2144 = vmatpush3.bf16.msra.mxu1 %v2288_v27  ;;  %v2365_v20 = vld [vmem:[%s3046_s3 + $0x64] ss:$8 sps:$4 sm:$0xff]   ;;  %v2363_v21 = vld [vmem:[%s3046_s3 + $0x60] ss:$8 sps:$4 sm:$0xff]   ;;  %v2368_v22 = vld [vmem:[%s3046_s3 + $0x74] ss:$8 sps:$4 sm:$0xff]  }
  0x22   : > { %2145 = vmatprep.subr.bf16.mxu1 %v2291_v30  ;;  %v2366_v23 = vld [vmem:[%s3046_s3 + $0x70] ss:$8 sps:$4 sm:$0xff]   ;;  %v2449_v24 = vmov 0   ;;  %v1950_v26 = vld [vmem:[%s3045_s2] ss:$0 sm:$0xff] }
  0x23   : > { %2106 = vmatpush3.bf16.msra.mxu0 %v2290_v29 }
  0x24   : > { %2171 = vmatprep.subr.bf16.mxu0 %v2296_v34 }
  0x25   : > { %2146 = vmatpush3.bf16.msra.mxu1 %v2295_v33 }
  0x26   : > { %910 = vmatmul.mubr.bf16.vlgmr.msra.gmra.mrb[0].mxu0 %v2292_v31  ;;  %1184 = vmatprep.subr.bf16.mxu1 %v2347_v8 }
  0x27   : > { %2172 = vmatpush3.bf16.msra.mxu0 %v2300_v37  ;;  %917 = vmatprep.mubr.bf16.mxu0 %v2303_v40 }
  0x28   : > { %975 = vmatmul.mubr.bf16.vlgmr.msra.gmra.mrb[0].mxu1 %v2297_v35  ;;  %2173 = vmatprep.subr.bf16.mxu0 %v2301_v38 }
  0x29   : > { %982 = vmatprep.mubr.bf16.mxu1 %v2307_v43  ;;  %1185 = vmatpush1.bf16.msra.mxu1 %v2345_v9 }
  0x2a   : > { %1186 = vmatprep.subr.bf16.mxu1 %v2350_v10 }
  0x2b   : > { %2174 = vmatpush3.bf16.msra.mxu0 %v2302_v39 }
  0x2c   : > { %2175 = vmatprep.subr.bf16.mxu0 %v2306_v42 }
  0x2d   : > { %1187 = vmatpush1.bf16.msra.mxu1 %v2348_v11 }
  0x2e   : > { %918 = vmatmul.mubr.bf16.gmra.mrb[4].mxu0 %v2305_v41  ;;  %1188 = vmatprep.subr.bf16.mxu1 %v2353_v12 }
  0x2f   : > { %2176 = vmatpush3.bf16.msra.mxu0 %v2309_v44  ;;  %925 = vmatprep.mubr.bf16.mxu0 %v2313_v48 }
  0x30   : > { %983 = vmatmul.mubr.bf16.gmra.mrb[4].mxu1 %v2310_v45  ;;  %2177 = vmatprep.subr.bf16.mxu0 %v2311_v46 }
  0x31   : > { %990 = vmatprep.mubr.bf16.mxu1 %v2317_v51  ;;  %1189 = vmatpush1.bf16.msra.mxu1 %v2351_v13 }
  0x32   : > { %1190 = vmatprep.subr.bf16.mxu1 %v2356_v14 }
  0x33   : > { %2178 = vmatpush3.bf16.msra.mxu0 %v2312_v47 }
  0x34   : > { %2179 = vmatprep.subr.bf16.mxu0 %v2316_v50 }
  0x35   : > { %1191 = vmatpush1.bf16.msra.mxu1 %v2354_v15 }
  0x36   : > { %926 = vmatmul.mubr.bf16.gmra.mrb[8].mxu0 %v2315_v49  ;;  %1192 = vmatprep.subr.bf16.mxu1 %v2359_v16 }
  0x37   : > { %2180 = vmatpush3.bf16.msra.mxu0 %v2319_v52  ;;  %933 = vmatprep.mubr.bf16.mxu0 %v2323_v56 }
  0x38   : > { %991 = vmatmul.mubr.bf16.gmra.mrb[8].mxu1 %v2320_v53  ;;  %2181 = vmatprep.subr.bf16.mxu0 %v2321_v54 }
  0x39   : > { %998 = vmatprep.mubr.bf16.mxu1 %v2327_v59  ;;  %1193 = vmatpush1.bf16.msra.mxu1 %v2357_v17 }
  0x3a   : > { %1194 = vmatprep.subr.bf16.mxu1 %v2362_v18 }
  0x3b   : > { %2182 = vmatpush3.bf16.msra.mxu0 %v2322_v55 }
  0x3c   : > { %2183 = vmatprep.subr.bf16.mxu0 %v2326_v58 }
  0x3d   : > { %1195 = vmatpush1.bf16.msra.mxu1 %v2360_v19 }
  0x3e   : > { %934 = vmatmul.mubr.bf16.gmra.mrb[12].mxu0 %v2325_v57  ;;  %1196 = vmatprep.subr.bf16.mxu1 %v2365_v20 }
  0x3f   : > { %1039 = vmatprep.mubr.bf16.mxu0 %v2335_v63  ;;  %2184 = vmatpush3.bf16.msra.mxu0 %v2329_v60 }
  0x40   : > { %999 = vmatmul.mubr.bf16.gmra.mrb[12].mxu1 %v2330_v61  ;;  %2185 = vmatprep.subr.bf16.mxu0 %v2331_v62 }
  0x41   : > { %1197 = vmatpush1.bf16.msra.mxu1 %v2363_v21  ;;  %1216 = vmatprep.mubr.bf16.mxu1 %v2449_v24 }
  0x42   : > { %1198 = vmatprep.subr.bf16.mxu1 %v2368_v22 }
  0x43   : > { %2186 = vmatpush3.bf16.msra.mxu0 %v2332_v0 }
  0x45   : > { %1199 = vmatpush1.bf16.msra.mxu1 %v2366_v23 }
  0x46   : > { %1040 = vmatmul.mubr.bf16.vlgmr.msra.gmra.mrb[16].mxu0 %v2333_v1 }
  0x47   : > { %1047 = vmatprep.mubr.bf16.mxu0 %v2336_v2 }
  0x4e   : > { %1048 = vmatmul.mubr.bf16.gmra.mrb[20].mxu0 %v2338_v3 }
  0x4f   : > { %1055 = vmatprep.mubr.bf16.mxu0 %v2339_v4 }
  0x56   : > { %1056 = vmatmul.mubr.bf16.gmra.mrb[24].mxu0 %v2341_v5 }
  0x57   : > { %1063 = vmatprep.mubr.bf16.mxu0 %v2342_v6 }
  0x5e   : > { %1064 = vmatmul.mubr.bf16.gmra.mrb[28].mxu0 %v2344_v7 }
  0xf9   : > { %v2107_v25 = vpop.f32.mrb[0].mxu0 }
  0xfa   : > { %v2108_v27 = vpop.f32.mrb[1].mxu0 }
  0xfb   : > { %v2109_v28 = vadd.f32 %v2108_v27, %v2107_v25  ;;  %v2110_v29 = vpop.f32.mrb[2].mxu0  ;;  %v2147_v30 = vpop.f32.mrb[0].mxu1 }
  0xfc   : > { %v2111_v31 = vpop.f32.mrb[3].mxu0  ;;  %v2148_v34 = vpop.f32.mrb[1].mxu1 }
  0xfd   : > { %v912_v32 = vadd.f32 %v2109_v28, %v1950_v26  ;;  %v2112_v33 = vadd.f32 %v2111_v31, %v2110_v29  ;;  %v2149_v35 = vadd.f32 %v2148_v34, %v2147_v30  ;;  %v2150_v36 = vpop.f32.mrb[2].mxu1 }
  0xfe   : > { %v2151_v38 = vpop.f32.mrb[3].mxu1 }
  0xff   : > { %v915_v37 = vadd.f32 %v2112_v33, %v1950_v26  ;;  %v977_v39 = vadd.f32 %v2149_v35, %v912_v32  ;;  %v2152_v40 = vadd.f32 %v2151_v38, %v2150_v36 }
 0x101   : > { %v2113_v41 = vpop.f32.mrb[4].mxu0  ;;  %v980_v42 = vadd.f32 %v2152_v40, %v915_v37 }
 0x102   : > { %v2114_v43 = vpop.f32.mrb[5].mxu0 }
 0x103   : > { %v2115_v44 = vadd.f32 %v2114_v43, %v2113_v41  ;;  %v2116_v45 = vpop.f32.mrb[6].mxu0  ;;  %v2153_v46 = vpop.f32.mrb[4].mxu1 }
 0x104   : > { %v2117_v47 = vpop.f32.mrb[7].mxu0  ;;  %v2154_v50 = vpop.f32.mrb[5].mxu1 }
 0x105   : > { %v920_v48 = vadd.f32 %v2115_v44, %v1950_v26  ;;  %v2118_v49 = vadd.f32 %v2117_v47, %v2116_v45  ;;  %v2155_v51 = vadd.f32 %v2154_v50, %v2153_v46  ;;  %v2156_v52 = vpop.f32.mrb[6].mxu1 }
 0x106   : > { %v2157_v54 = vpop.f32.mrb[7].mxu1 }
 0x107   : > { %v923_v53 = vadd.f32 %v2118_v49, %v1950_v26  ;;  %v985_v55 = vadd.f32 %v2155_v51, %v920_v48  ;;  %v2158_v56 = vadd.f32 %v2157_v54, %v2156_v52 }
 0x109   : > { %v2119_v57 = vpop.f32.mrb[8].mxu0  ;;  %v988_v58 = vadd.f32 %v2158_v56, %v923_v53 }
 0x10a   : > { %v2120_v59 = vpop.f32.mrb[9].mxu0 }
 0x10b   : > { %v2121_v60 = vadd.f32 %v2120_v59, %v2119_v57  ;;  %v2122_v61 = vpop.f32.mrb[10].mxu0  ;;  %v2159_v62 = vpop.f32.mrb[8].mxu1 }
 0x10c   : > { %v2123_v63 = vpop.f32.mrb[11].mxu0  ;;  %v2160_v2 = vpop.f32.mrb[9].mxu1 }
 0x10d   : > { %v928_v0 = vadd.f32 %v2121_v60, %v1950_v26  ;;  %v2124_v1 = vadd.f32 %v2123_v63, %v2122_v61  ;;  %v2161_v3 = vadd.f32 %v2160_v2, %v2159_v62  ;;  %v2162_v4 = vpop.f32.mrb[10].mxu1  ;;  %v2369_v63 = vld [vmem:[%s3048_s5 + $0x40] sm:$0xff]   ;;  %v2372_v2 = vld [vmem:[%s3048_s5 + $0x8] sm:$0xff]  }
 0x10e   : > { %v2163_v6 = vpop.f32.mrb[11].mxu1  ;;  %2211 = vmatprep.subr.bf16.mxu0 %v2369_v63 }
 0x10f   : > { %v931_v5 = vadd.f32 %v2124_v1, %v1950_v26  ;;  %v993_v7 = vadd.f32 %v2161_v3, %v928_v0  ;;  %v2164_v8 = vadd.f32 %v2163_v6, %v2162_v4  ;;  %v2370_v0 = vld [vmem:[%s3048_s5] sm:$0xff]   ;;  %v2371_v1 = vld [vmem:[%s3048_s5 + $0x48] sm:$0xff]   ;;  %v2373_v3 = vld [vmem:[%s3048_s5 + $0x50] sm:$0xff]  }
 0x110   : > { %2212 = vmatpush3.bf16.msra.mxu0 %v2370_v0  ;;  %v2374_v4 = vld [vmem:[%s3048_s5 + $0x10] sm:$0xff]   ;;  %v2376_v6 = vld [vmem:[%s3048_s5 + $0x18] sm:$0xff]  }
 0x111   : > { %v2125_v9 = vpop.f32.mrb[12].mxu0  ;;  %v996_v10 = vadd.f32 %v2164_v8, %v931_v5  ;;  %2213 = vmatprep.subr.bf16.mxu0 %v2371_v1  ;;  %v2375_v5 = vld [vmem:[%s3048_s5 + $0x58] sm:$0xff]   ;;  %v2378_v8 = vld [vmem:[%s3048_s5 + $0x20] sm:$0xff]  }
 0x112   : > { %v2126_v11 = vpop.f32.mrb[13].mxu0 }
 0x113   : > { %v2127_v12 = vadd.f32 %v2126_v11, %v2125_v9  ;;  %v2128_v13 = vpop.f32.mrb[14].mxu0  ;;  %v2165_v14 = vpop.f32.mrb[12].mxu1  ;;  %v2379_v9 = vld [vmem:[%s3048_s5 + $0x68] sm:$0xff]   ;;  %v2381_v11 = vld [vmem:[%s3048_s5 + $0x70] sm:$0xff]  }
 0x114   : > { %v2129_v15 = vpop.f32.mrb[15].mxu0  ;;  %v2166_v18 = vpop.f32.mrb[13].mxu1  ;;  %2214 = vmatpush3.bf16.msra.mxu0 %v2372_v2 }
 0x115   : > { %v936_v16 = vadd.f32 %v2127_v12, %v1950_v26  ;;  %v2130_v17 = vadd.f32 %v2129_v15, %v2128_v13  ;;  %v2167_v19 = vadd.f32 %v2166_v18, %v2165_v14  ;;  %v2168_v20 = vpop.f32.mrb[14].mxu1  ;;  %2215 = vmatprep.subr.bf16.mxu0 %v2373_v3  ;;  %v2382_v12 = vld [vmem:[%s3048_s5 + $0x30] sm:$0xff]   ;;  %v2383_v13 = vld [vmem:[%s3048_s5 + $0x78] sm:$0xff]   ;;  %v2385_v15 = vld [vmem:[%s3050_s7] ss:$8 sps:$4 sm:$0xff]  }
 0x116   : > { %v2169_v22 = vpop.f32.mrb[15].mxu1  ;;  %v2384_v14 = vld [vmem:[%s3048_s5 + $0x38] sm:$0xff]  }
 0x117   : > { %v939_v21 = vadd.f32 %v2130_v17, %v1950_v26  ;;  %v1001_v23 = vadd.f32 %v2167_v19, %v936_v16  ;;  %v2170_v25 = vadd.f32 %v2169_v22, %v2168_v20  ;;  %v2387_v16 = vld [vmem:[%s3050_s7 + $0x4] ss:$8 sps:$4 sm:$0xff]   ;;  %v2390_v17 = vld [vmem:[%s3050_s7 + $0x14] ss:$8 sps:$4 sm:$0xff]   ;;  %v2388_v18 = vld [vmem:[%s3050_s7 + $0x10] ss:$8 sps:$4 sm:$0xff]  }
 0x118   : > { %2216 = vmatpush3.bf16.msra.mxu0 %v2374_v4  ;;  %1737 = vmatprep.subr.bf16.mxu1 %v2387_v16  ;;  %v2393_v19 = vld [vmem:[%s3050_s7 + $0x24] ss:$8 sps:$4 sm:$0xff]   ;;  %v2391_v20 = vld [vmem:[%s3050_s7 + $0x20] ss:$8 sps:$4 sm:$0xff]   ;;  %v2394_v22 = vld [vmem:[%s3050_s7 + $0x30] ss:$8 sps:$4 sm:$0xff]  }
 0x119   : > { %v1004_v27 = vadd.f32 %v2170_v25, %v939_v21  ;;  %v2187_v28 = vpop.f32.mrb[16].mxu0  ;;  %2217 = vmatprep.subr.bf16.mxu0 %v2375_v5  ;;  %v2396_v21 = vld [vmem:[%s3050_s7 + $0x34] ss:$8 sps:$4 sm:$0xff]   ;;  %v2397_v25 = vld [vmem:[%s3050_s7 + $0x40] ss:$8 sps:$4 sm:$0xff]  }
 0x11a   : > { %v2188_v29 = vpop.f32.mrb[17].mxu0 }
 0x11b   : > { %v2189_v30 = vadd.f32 %v2188_v29, %v2187_v28  ;;  %v2190_v31 = vpop.f32.mrb[18].mxu0 }
 0x11c   : > { %v2191_v32 = vpop.f32.mrb[19].mxu0  ;;  %2218 = vmatpush3.bf16.msra.mxu0 %v2376_v6 }
 0x11d   : > { %v2738_v33 = vadd.f32 %v2189_v30, %v977_v39  ;;  %v2192_v34 = vadd.f32 %v2191_v32, %v2190_v31  ;;  %v1092_v30 = vld [vmem:[%s3047_s4] sm:$0x3] }
 0x11f   : > { %v2740_v35 = vadd.f32 %v2192_v34, %v980_v42 }
 0x121   : > { %v1072_v36 = vpack.c.bf16 %v2740_v35, %v2738_v33  ;;  %v2193_v37 = vpop.f32.mrb[20].mxu0 }
 0x122   : > { %v2194_v38 = vpop.f32.mrb[21].mxu0 }
 0x123   : > { %v2195_v26 = vadd.f32 %v2194_v38, %v2193_v37  ;;  %v2196_v40 = vpop.f32.mrb[22].mxu0  ;;  %1217 = vmatmul.mubr.bf16.vlgmr.msra.gmra.mrb[16].mxu1 %v1072_v36 }
 0x124   : > { %v2197_v41 = vpop.f32.mrb[23].mxu0  ;;  %1226 = vmatprep.mubr.bf16.mxu1 %v2449_v24  ;;  %1738 = vmatpush1.bf16.msra.mxu1 %v2385_v15 }
 0x125   : > { %v2745_v43 = vadd.f32 %v2195_v26, %v985_v55  ;;  %v2198_v44 = vadd.f32 %v2197_v41, %v2196_v40  ;;  %1739 = vmatprep.subr.bf16.mxu1 %v2390_v17 }
 0x127   : > { %v2747_v45 = vadd.f32 %v2198_v44, %v988_v58 }
 0x128   : > { %1740 = vmatpush1.bf16.msra.mxu1 %v2388_v18 }
 0x129   : > { %v2199_v39 = vpop.f32.mrb[24].mxu0  ;;  %v1073_v42 = vpack.c.bf16 %v2747_v45, %v2745_v43  ;;  %1741 = vmatprep.subr.bf16.mxu1 %v2393_v19 }
 0x12a   : > { %v2200_v46 = vpop.f32.mrb[25].mxu0 }
 0x12b   : > { %v2201_v47 = vadd.f32 %v2200_v46, %v2199_v39  ;;  %v2202_v48 = vpop.f32.mrb[26].mxu0  ;;  %1227 = vmatmul.mubr.bf16.gmra.mrb[20].mxu1 %v1073_v42 }
 0x12c   : > { %v2203_v49 = vpop.f32.mrb[27].mxu0  ;;  %1236 = vmatprep.mubr.bf16.mxu1 %v2449_v24  ;;  %1742 = vmatpush1.bf16.msra.mxu1 %v2391_v20 }
 0x12d   : > { %v2752_v50 = vadd.f32 %v2201_v47, %v993_v7  ;;  %v2204_v51 = vadd.f32 %v2203_v49, %v2202_v48  ;;  %v2377_v7 = vld [vmem:[%s3048_s5 + $0x60] sm:$0xff]   ;;  %1743 = vmatprep.subr.bf16.mxu1 %v2396_v21 }
 0x12e   : > { %2219 = vmatprep.subr.bf16.mxu0 %v2377_v7 }
 0x12f   : > { %v2754_v52 = vadd.f32 %v2204_v51, %v996_v10  ;;  %2220 = vmatpush3.bf16.msra.mxu0 %v2378_v8  ;;  %v2380_v10 = vld [vmem:[%s3048_s5 + $0x28] sm:$0xff]  }
 0x130   : > { %2221 = vmatprep.subr.bf16.mxu0 %v2379_v9  ;;  %1744 = vmatpush1.bf16.msra.mxu1 %v2394_v22 }
 0x131   : > { %v2205_v53 = vpop.f32.mrb[28].mxu0  ;;  %v1074_v54 = vpack.c.bf16 %v2754_v52, %v2752_v50 }
 0x132   : > { %v2206_v55 = vpop.f32.mrb[29].mxu0 }
 0x133   : > { %v2207_v56 = vadd.f32 %v2206_v55, %v2205_v53  ;;  %v2208_v57 = vpop.f32.mrb[30].mxu0  ;;  %1237 = vmatmul.mubr.bf16.gmra.mrb[24].mxu1 %v1074_v54  ;;  %2222 = vmatpush3.bf16.msra.mxu0 %v2380_v10 }
 0x134   : > { %v2209_v58 = vpop.f32.mrb[31].mxu0  ;;  %1246 = vmatprep.mubr.bf16.mxu1 %v2449_v24  ;;  %2223 = vmatprep.subr.bf16.mxu0 %v2381_v11 }
 0x135   : > { %v2759_v59 = vadd.f32 %v2207_v56, %v1001_v23  ;;  %v2210_v60 = vadd.f32 %v2209_v58, %v2208_v57  ;;  %v2399_v23 = vld [vmem:[%s3050_s7 + $0x44] ss:$8 sps:$4 sm:$0xff]  }
 0x136   : > { %1745 = vmatprep.subr.bf16.mxu1 %v2399_v23 }
 0x137   : > { %v2761_v61 = vadd.f32 %v2210_v60, %v1004_v27  ;;  %2224 = vmatpush3.bf16.msra.mxu0 %v2382_v12  ;;  %1746 = vmatpush1.bf16.msra.mxu1 %v2397_v25  ;;  %v1094_v27 = vlaneseq }
 0x138   : > { %2225 = vmatprep.subr.bf16.mxu0 %v2383_v13 }
 0x139   : > { %v1075_v62 = vpack.c.bf16 %v2761_v61, %v2759_v59  ;;  %v2844_v28 = vshrl.u32 %v1094_v27, 7 }
 0x13b   : > { %1247 = vmatmul.mubr.bf16.gmra.mrb[28].mxu1 %v1075_v62  ;;  %2226 = vmatpush3.bf16.msra.mxu0 %v2384_v14  ;;  %v1096_v29 = vsub.s32 0, %v2844_v28  ;;  %v1100_v31 = vsub.s32 1, %v2844_v28 }
 0x13c   : > { %1769 = vmatprep.mubr.bf16.mxu1 %v2449_v24 }
 0x13d   : > { %v2853_v32 = vrot.slane %v1092_v30, %v1096_v29  ;;  %v2857_v34 = vrot.slane %v1092_v30, %v1100_v31 }
 0x1f6   : > { %v1218_v36 = vpop.f32.mrb[16].mxu1 }
 0x1f7   : > { %v2860_v37 = vadd.f32 %v1218_v36, %v2853_v32  ;;  %v1220_v38 = vpop.f32.mrb[17].mxu1 }
 0x1f8   : > { %v2863_v26 = vadd.f32 %v1220_v38, %v2857_v34  ;;  %v1222_v40 = vpop.f32.mrb[18].mxu1 }
 0x1f9   : > { %v1257_v41 = vmul.f32 %v2860_v37, %v2860_v37  ;;  %v2868_v44 = vadd.f32 %v1222_v40, %v2853_v32  ;;  %v1224_v39 = vpop.f32.mrb[19].mxu1 }
 0x1fa   : > { %v1258_v42 = vmul.f32 %v2863_v26, %v2863_v26  ;;  %v2873_v46 = vadd.f32 %v1224_v39, %v2857_v34 }
 0x1fb   : > { %v1273_v47 = vmul.f32 %v1257_v41, %v2860_v37  ;;  %v1259_v48 = vmul.f32 %v2868_v44, %v2868_v44 }
 0x1fc   : > { %v1274_v49 = vmul.f32 %v1258_v42, %v2863_v26  ;;  %v1260_v51 = vmul.f32 %v2873_v46, %v2873_v46 }
 0x1fd   : > { %v1289_v53 = vmul.f32 0.044715, %v1273_v47  ;;  %v1275_v54 = vmul.f32 %v1259_v48, %v2868_v44 }
 0x1fe   : > { %v1290_v55 = vmul.f32 0.044715, %v1274_v49  ;;  %v1276_v56 = vmul.f32 %v1260_v51, %v2873_v46  ;;  %v1228_v57 = vpop.f32.mrb[20].mxu1 }
 0x1ff   : > { %v1305_v58 = vadd.f32 %v1289_v53, %v2860_v37  ;;  %v1291_v60 = vmul.f32 0.044715, %v1275_v54  ;;  %v2885_v62 = vadd.f32 %v1228_v57, %v2853_v32  ;;  %v1230_v63 = vpop.f32.mrb[21].mxu1 }
 0x200   : > { %v1306_v0 = vadd.f32 %v1290_v55, %v2863_v26  ;;  %v1292_v1 = vmul.f32 0.044715, %v1276_v56  ;;  %v2889_v2 = vadd.f32 %v1230_v63, %v2857_v34  ;;  %v1232_v3 = vpop.f32.mrb[22].mxu1 }
 0x201   : > { %v1321_v4 = vmul.f32 0.7978846, %v1305_v58  ;;  %v1307_v5 = vadd.f32 %v1291_v60, %v2868_v44  ;;  %v1261_v6 = vmul.f32 %v2885_v62, %v2885_v62  ;;  %v2895_v7 = vadd.f32 %v1232_v3, %v2853_v32  ;;  %v1234_v8 = vpop.f32.mrb[23].mxu1 }
 0x202   : > { %v1322_v9 = vmul.f32 0.7978846, %v1306_v0  ;;  %v1308_v10 = vadd.f32 %v1292_v1, %v2873_v46  ;;  %v1262_v11 = vmul.f32 %v2889_v2, %v2889_v2  ;;  %v2901_v12 = vadd.f32 %v1234_v8, %v2857_v34 }
 0x203   : > { %2409 = vtanh.f32 %v1321_v4  ;;  %v1323_v13 = vmul.f32 0.7978846, %v1307_v5  ;;  %v1277_v14 = vmul.f32 %v1261_v6, %v2885_v62  ;;  %v1263_v15 = vmul.f32 %v2895_v7, %v2895_v7 }
 0x204   : > { %2411 = vtanh.f32 %v1322_v9  ;;  %v1324_v16 = vmul.f32 0.7978846, %v1308_v10  ;;  %v1278_v17 = vmul.f32 %v1262_v11, %v2889_v2  ;;  %v1264_v18 = vmul.f32 %v2901_v12, %v2901_v12 }
 0x205   : > { %2413 = vtanh.f32 %v1323_v13  ;;  %v1293_v19 = vmul.f32 0.044715, %v1277_v14  ;;  %v1279_v20 = vmul.f32 %v1263_v15, %v2895_v7 }
 0x206   : > { %v1294_v21 = vmul.f32 0.044715, %v1278_v17  ;;  %v1280_v22 = vmul.f32 %v1264_v18, %v2901_v12  ;;  %v1238_v23 = vpop.f32.mrb[24].mxu1  ;;  %2415 = vtanh.f32 %v1324_v16 }
 0x207   : > { %v1309_v25 = vadd.f32 %v1293_v19, %v2885_v62  ;;  %v1295_v27 = vmul.f32 0.044715, %v1279_v20  ;;  %v2913_v30 = vadd.f32 %v1238_v23, %v2853_v32  ;;  %v1240_v36 = vpop.f32.mrb[25].mxu1 }
 0x208   : > { %v1310_v38 = vadd.f32 %v1294_v21, %v2889_v2  ;;  %v1296_v40 = vmul.f32 0.044715, %v1280_v22  ;;  %v2917_v41 = vadd.f32 %v1240_v36, %v2857_v34  ;;  %v1242_v39 = vpop.f32.mrb[26].mxu1 }
 0x209   : > { %v1325_v42 = vmul.f32 0.7978846, %v1309_v25  ;;  %v1311_v47 = vadd.f32 %v1295_v27, %v2895_v7  ;;  %v1265_v48 = vmul.f32 %v2913_v30, %v2913_v30  ;;  %v2923_v49 = vadd.f32 %v1242_v39, %v2853_v32  ;;  %v1244_v51 = vpop.f32.mrb[27].mxu1 }
 0x20a   : > { %v1326_v53 = vmul.f32 0.7978846, %v1310_v38  ;;  %v1312_v54 = vadd.f32 %v1296_v40, %v2901_v12  ;;  %v1266_v55 = vmul.f32 %v2917_v41, %v2917_v41  ;;  %v2929_v56 = vadd.f32 %v1244_v51, %v2857_v34 }
 0x20b   : > { %2417 = vtanh.f32 %v1325_v42  ;;  %v1327_v57 = vmul.f32 0.7978846, %v1311_v47  ;;  %v1281_v58 = vmul.f32 %v1265_v48, %v2913_v30  ;;  %v1267_v60 = vmul.f32 %v2923_v49, %v2923_v49 }
 0x20c   : > { %2419 = vtanh.f32 %v1326_v53  ;;  %v1328_v63 = vmul.f32 0.7978846, %v1312_v54  ;;  %v1282_v0 = vmul.f32 %v1266_v55, %v2917_v41  ;;  %v1268_v1 = vmul.f32 %v2929_v56, %v2929_v56 }
 0x20d   : > { %v2410_v3 = vpop.eup %2409  ;;  %2421 = vtanh.f32 %v1327_v57  ;;  %v1297_v4 = vmul.f32 0.044715, %v1281_v58  ;;  %v1283_v5 = vmul.f32 %v1267_v60, %v2923_v49 }
 0x20e   : > { %v2412_v6 = vpop.eup %2411  ;;  %v1353_v8 = vadd.f32 1.0, %v2410_v3  ;;  %2423 = vtanh.f32 %v1328_v63  ;;  %v1298_v9 = vmul.f32 0.044715, %v1282_v0  ;;  %v1284_v10 = vmul.f32 %v1268_v1, %v2929_v56  ;;  %v1248_v11 = vpop.f32.mrb[28].mxu1 }
 0x20f   : > { %v2414_v13 = vpop.eup %2413  ;;  %v1313_v14 = vadd.f32 %v1297_v4, %v2913_v30  ;;  %v1299_v15 = vmul.f32 0.044715, %v1283_v5  ;;  %v2941_v16 = vadd.f32 %v1248_v11, %v2853_v32  ;;  %v1250_v17 = vpop.f32.mrb[29].mxu1  ;;  %v1354_v18 = vadd.f32 1.0, %v2412_v6 }
 0x210   : > { %v1369_v19 = vmul.f32 0.5, %v1353_v8  ;;  %v1355_v20 = vadd.f32 1.0, %v2414_v13  ;;  %v1314_v21 = vadd.f32 %v1298_v9, %v2917_v41  ;;  %v1300_v22 = vmul.f32 0.044715, %v1284_v10  ;;  %v1252_v23 = vpop.f32.mrb[30].mxu1  ;;  %v2416_v39 = vpop.eup %2415 }
 0x211   : > { %v1329_v25 = vmul.f32 0.7978846, %v1313_v14  ;;  %v1315_v27 = vadd.f32 %v1299_v15, %v2923_v49  ;;  %v1269_v36 = vmul.f32 %v2941_v16, %v2941_v16  ;;  %v2948_v38 = vadd.f32 %v1250_v17, %v2857_v34  ;;  %v1254_v40 = vpop.f32.mrb[31].mxu1 }
 0x212   : > { %v1385_v42 = vmul.f32 %v1369_v19, %v2860_v37  ;;  %v1371_v47 = vmul.f32 0.5, %v1355_v20  ;;  %v1330_v48 = vmul.f32 0.7978846, %v1314_v21  ;;  %v1316_v51 = vadd.f32 %v1300_v22, %v2929_v56 }
 0x213   : > { %2425 = vtanh.f32 %v1329_v25  ;;  %v1331_v53 = vmul.f32 0.7978846, %v1315_v27  ;;  %v1285_v54 = vmul.f32 %v1269_v36, %v2941_v16  ;;  %v1270_v55 = vmul.f32 %v2948_v38, %v2948_v38 }
 0x214   : > { %v1387_v57 = vmul.f32 %v1371_v47, %v2868_v44  ;;  %2427 = vtanh.f32 %v1330_v48  ;;  %v1332_v58 = vmul.f32 0.7978846, %v1316_v51  ;;  %v2957_v60 = vadd.f32 %v1252_v23, %v2853_v32 }
 0x215   : > { %v2418_v63 = vpop.eup %2417  ;;  %2429 = vtanh.f32 %v1331_v53  ;;  %v1301_v37 = vmul.f32 0.044715, %v1285_v54  ;;  %v1286_v0 = vmul.f32 %v1270_v55, %v2948_v38  ;;  %v2961_v1 = vadd.f32 %v1254_v40, %v2857_v34 }
 0x216   : > { %v2420_v3 = vpop.eup %2419  ;;  %v1401_v4 = vpack.c.bf16 %v1387_v57, %v1385_v42  ;;  %2431 = vtanh.f32 %v1332_v58  ;;  %v1271_v5 = vmul.f32 %v2957_v60, %v2957_v60  ;;  %v1356_v44 = vadd.f32 1.0, %v2416_v39 }
 0x217   : > { %v2422_v6 = vpop.eup %2421  ;;  %v1317_v8 = vadd.f32 %v1301_v37, %v2941_v16  ;;  %v1302_v32 = vmul.f32 0.044715, %v1286_v0  ;;  %v1272_v9 = vmul.f32 %v2961_v1, %v2961_v1  ;;  %v1370_v10 = vmul.f32 0.5, %v1354_v18 }
 0x218   : > { %v2424_v11 = vpop.eup %2423  ;;  %v1287_v13 = vmul.f32 %v1271_v5, %v2957_v60  ;;  %v1372_v34 = vmul.f32 0.5, %v1356_v44  ;;  %v1358_v14 = vadd.f32 1.0, %v2420_v3  ;;  %v1357_v15 = vadd.f32 1.0, %v2418_v63 }
 0x219   : > { %v1333_v17 = vmul.f32 0.7978846, %v1317_v8  ;;  %v1318_v19 = vadd.f32 %v1302_v32, %v2948_v38  ;;  %v1288_v20 = vmul.f32 %v1272_v9, %v2961_v1  ;;  %v1386_v21 = vmul.f32 %v1370_v10, %v2863_v26 }
 0x21a   : > { %v1303_v22 = vmul.f32 0.044715, %v1287_v13  ;;  %v1388_v23 = vmul.f32 %v1372_v34, %v2873_v46  ;;  %v1360_v25 = vadd.f32 1.0, %v2424_v11  ;;  %v1374_v27 = vmul.f32 0.5, %v1358_v14 }
 0x21b   : > { %2433 = vtanh.f32 %v1333_v17  ;;  %v1334_v18 = vmul.f32 0.7978846, %v1318_v19  ;;  %v1304_v36 = vmul.f32 0.044715, %v1288_v20  ;;  %v1359_v40 = vadd.f32 1.0, %v2422_v6 }
 0x21c   : > { %v1319_v39 = vadd.f32 %v1303_v22, %v2957_v60  ;;  %v1402_v42 = vpack.c.bf16 %v1388_v23, %v1386_v21  ;;  %v1376_v47 = vmul.f32 0.5, %v1360_v25  ;;  %v1373_v53 = vmul.f32 0.5, %v1357_v15 }
 0x21d   : > { %v2426_v48 = vpop.eup %2425  ;;  %2435 = vtanh.f32 %v1334_v18  ;;  %v1320_v51 = vadd.f32 %v1304_v36, %v2961_v1  ;;  %v1375_v54 = vmul.f32 0.5, %v1359_v40  ;;  %v1390_v46 = vmul.f32 %v1374_v27, %v2889_v2 }
 0x21e   : > { %v2428_v26 = vpop.eup %2427  ;;  %v1335_v55 = vmul.f32 0.7978846, %v1319_v39  ;;  %1569 = vmatprep.mubr.bf16.mxu0 %v1402_v42  ;;  %v1392_v57 = vmul.f32 %v1376_v47, %v2901_v12  ;;  %v1361_v58 = vadd.f32 1.0, %v2426_v48  ;;  %v1389_v0 = vmul.f32 %v1373_v53, %v2885_v62  ;;  %v2402_v47 = vld [vmem:[%s3050_s7 + $0x54] ss:$8 sps:$4 sm:$0xff]  }
 0x21f   : > { %v2430_v63 = vpop.eup %2429  ;;  %v1336_v37 = vmul.f32 0.7978846, %v1320_v51  ;;  %1570 = vmatmul.mubr.bf16.vlgmr.msra.gmra.mrb[32].mxu0 %v1401_v4  ;;  %v1391_v3 = vmul.f32 %v1375_v54, %v2895_v7  ;;  %v1362_v5 = vadd.f32 1.0, %v2428_v26  ;;  %v2400_v48 = vld [vmem:[%s3050_s7 + $0x50] ss:$8 sps:$4 sm:$0xff]   ;;  %1747 = vmatprep.subr.bf16.mxu1 %v2402_v47 }
 0x220   : > { %v2432_v44 = vpop.eup %2431  ;;  %2437 = vtanh.f32 %v1335_v55  ;;  %v1404_v6 = vpack.c.bf16 %v1392_v57, %v1390_v46  ;;  %v1363_v8 = vadd.f32 1.0, %v2430_v63  ;;  %v1377_v32 = vmul.f32 0.5, %v1361_v58  ;;  %1748 = vmatpush1.bf16.msra.mxu1 %v2400_v48  ;;  %v2055_v58 = vld [vmem:[%s3049_s6] ss:$0 sm:$0xff] }
 0x221   : > { %2439 = vtanh.f32 %v1336_v37  ;;  %v1403_v9 = vpack.c.bf16 %v1391_v3, %v1389_v0  ;;  %v1364_v10 = vadd.f32 1.0, %v2432_v44  ;;  %v1378_v2 = vmul.f32 0.5, %v1362_v5 }
 0x222   : > { %1577 = vmatprep.mubr.bf16.mxu0 %v1404_v6  ;;  %v1379_v12 = vmul.f32 0.5, %v1363_v8  ;;  %v1393_v13 = vmul.f32 %v1377_v32, %v2913_v30 }
 0x223   : > { %v1380_v11 = vmul.f32 0.5, %v1364_v10  ;;  %v1394_v7 = vmul.f32 %v1378_v2, %v2917_v41 }
 0x224   : > { %v1395_v4 = vmul.f32 %v1379_v12, %v2923_v49 }
 0x225   : > { %v2434_v62 = vpop.eup %2433  ;;  %v1396_v34 = vmul.f32 %v1380_v11, %v2929_v56 }
 0x226   : > { %v1405_v14 = vpack.c.bf16 %v1395_v4, %v1393_v13  ;;  %v1365_v19 = vadd.f32 1.0, %v2434_v62 }
 0x227   : > { %v2436_v15 = vpop.eup %2435  ;;  %1578 = vmatmul.mubr.bf16.gmra.mrb[36].mxu0 %v1403_v9  ;;  %v1406_v17 = vpack.c.bf16 %v1396_v34, %v1394_v7 }
 0x228   : > { %v1366_v20 = vadd.f32 1.0, %v2436_v15  ;;  %v1381_v25 = vmul.f32 0.5, %v1365_v19 }
 0x229   : > { %1585 = vmatprep.mubr.bf16.mxu0 %v1406_v17 }
 0x22a   : > { %v2438_v21 = vpop.eup %2437  ;;  %v1382_v30 = vmul.f32 0.5, %v1366_v20  ;;  %v1397_v41 = vmul.f32 %v1381_v25, %v2941_v16  ;;  %v2405_v16 = vld [vmem:[%s3050_s7 + $0x64] ss:$8 sps:$4 sm:$0xff]  }
 0x22b   : > { %v2440_v22 = vpop.eup %2439  ;;  %v1367_v23 = vadd.f32 1.0, %v2438_v21  ;;  %1749 = vmatprep.subr.bf16.mxu1 %v2405_v16 }
 0x22c   : > { %v1368_v27 = vadd.f32 1.0, %v2440_v22  ;;  %v1398_v36 = vmul.f32 %v1382_v30, %v2948_v38  ;;  %v2403_v38 = vld [vmem:[%s3050_s7 + $0x60] ss:$8 sps:$4 sm:$0xff]  }
 0x22d   : > { %v1383_v18 = vmul.f32 0.5, %v1367_v23  ;;  %1750 = vmatpush1.bf16.msra.mxu1 %v2403_v38 }
 0x22e   : > { %v1384_v49 = vmul.f32 0.5, %v1368_v27 }
 0x22f   : > { %1586 = vmatmul.mubr.bf16.gmra.mrb[40].mxu0 %v1405_v14  ;;  %v1399_v56 = vmul.f32 %v1383_v18, %v2957_v60  ;;  %v2408_v60 = vld [vmem:[%s3050_s7 + $0x74] ss:$8 sps:$4 sm:$0xff]  }
 0x230   : > { %v1400_v40 = vmul.f32 %v1384_v49, %v2961_v1  ;;  %v2406_v1 = vld [vmem:[%s3050_s7 + $0x70] ss:$8 sps:$4 sm:$0xff]   ;;  %1751 = vmatprep.subr.bf16.mxu1 %v2408_v60  ;;  %v1645_v49 = vld [vmem:[%s3051_s8] sm:$0x3] }
 0x231   : > { %v1407_v39 = vpack.c.bf16 %v1399_v56, %v1397_v41  ;;  %1752 = vmatpush1.bf16.msra.mxu1 %v2406_v1  ;;  %v1650_v41 = vrot.slane %v1645_v49, %v1096_v29 }
 0x232   : > { %v1408_v42 = vpack.c.bf16 %v1400_v40, %v1398_v36 }
 0x234   : > { %1593 = vmatprep.mubr.bf16.mxu0 %v1408_v42 }
 0x237   : > { %1594 = vmatmul.mubr.bf16.gmra.mrb[44].mxu0 %v1407_v39 }
 0x2f2   : > { %v2227_v51 = vpop.f32.mrb[32].mxu0 }
 0x2f3   : > { %v2228_v53 = vpop.f32.mrb[33].mxu0 }
 0x2f4   : > { %v2229_v54 = vadd.f32 %v2228_v53, %v2227_v51  ;;  %v2230_v26 = vpop.f32.mrb[34].mxu0 }
 0x2f5   : > { %v2231_v55 = vpop.f32.mrb[35].mxu0 }
 0x2f6   : > { %v1602_v46 = vadd.f32 %v2229_v54, %v2738_v33  ;;  %v2232_v57 = vadd.f32 %v2231_v55, %v2230_v26 }
 0x2f8   : > { %v1603_v63 = vadd.f32 %v2232_v57, %v2740_v35  ;;  %v1617_v37 = vadd.f32 %v2055_v58, %v1602_v46 }
 0x2fa   : > { %v1618_v0 = vadd.f32 %v2055_v58, %v1603_v63  ;;  %v2233_v3 = vpop.f32.mrb[36].mxu0 }
 0x2fb   : > { %v2234_v5 = vpop.f32.mrb[37].mxu0 }
 0x2fc   : > { %v1625_v44 = vpack.c.bf16 %v1618_v0, %v1617_v37  ;;  %v2235_v6 = vadd.f32 %v2234_v5, %v2233_v3  ;;  %v2236_v8 = vpop.f32.mrb[38].mxu0 }
 0x2fd   : > { %v2237_v32 = vpop.f32.mrb[39].mxu0 }
 0x2fe   : > { %v1604_v9 = vadd.f32 %v2235_v6, %v2745_v43  ;;  %v2238_v10 = vadd.f32 %v2237_v32, %v2236_v8  ;;  %1770 = vmatmul.mubr.bf16.vlgmr.msra.gmra.mrb[32].mxu1 %v1625_v44 }
 0x2ff   : > { %1779 = vmatprep.mubr.bf16.mxu1 %v2449_v24 }
 0x300   : > { %v1605_v33 = vadd.f32 %v2238_v10, %v2747_v45  ;;  %v1619_v2 = vadd.f32 %v2055_v58, %v1604_v9 }
 0x302   : > { %v1620_v12 = vadd.f32 %v2055_v58, %v1605_v33  ;;  %v2239_v11 = vpop.f32.mrb[40].mxu0 }
 0x303   : > { %v2240_v35 = vpop.f32.mrb[41].mxu0 }
 0x304   : > { %v2241_v13 = vadd.f32 %v2240_v35, %v2239_v11  ;;  %v2242_v4 = vpop.f32.mrb[42].mxu0  ;;  %v1626_v62 = vpack.c.bf16 %v1620_v12, %v1619_v2 }
 0x305   : > { %v2243_v7 = vpop.f32.mrb[43].mxu0 }
 0x306   : > { %v1606_v34 = vadd.f32 %v2241_v13, %v2752_v50  ;;  %v2244_v14 = vadd.f32 %v2243_v7, %v2242_v4  ;;  %1780 = vmatmul.mubr.bf16.gmra.mrb[36].mxu1 %v1626_v62 }
 0x307   : > { %1789 = vmatprep.mubr.bf16.mxu1 %v2449_v24 }
 0x308   : > { %v1607_v43 = vadd.f32 %v2244_v14, %v2754_v52  ;;  %v1621_v15 = vadd.f32 %v2055_v58, %v1606_v34 }
 0x30a   : > { %v1622_v17 = vadd.f32 %v2055_v58, %v1607_v43  ;;  %v2245_v19 = vpop.f32.mrb[44].mxu0 }
 0x30b   : > { %v2246_v45 = vpop.f32.mrb[45].mxu0 }
 0x30c   : > { %v2247_v20 = vadd.f32 %v2246_v45, %v2245_v19  ;;  %v2248_v21 = vpop.f32.mrb[46].mxu0  ;;  %v1627_v22 = vpack.c.bf16 %v1622_v17, %v1621_v15 }
 0x30d   : > { %v2249_v23 = vpop.f32.mrb[47].mxu0 }
 0x30e   : > { %v1608_v25 = vadd.f32 %v2247_v20, %v2759_v59  ;;  %v2250_v27 = vadd.f32 %v2249_v23, %v2248_v21  ;;  %1790 = vmatmul.mubr.bf16.gmra.mrb[40].mxu1 %v1627_v22  ;;  %v1654_v59 = vrot.slane %v1645_v49, %v1100_v31 }
 0x30f   : > { %1799 = vmatprep.mubr.bf16.mxu1 %v2449_v24 }
 0x310   : > { %v1609_v50 = vadd.f32 %v2250_v27, %v2761_v61  ;;  %v1623_v30 = vadd.f32 %v2055_v58, %v1608_v25 }
 0x312   : > { %v1624_v18 = vadd.f32 %v2055_v58, %v1609_v50 }
 0x314   : > { %v1628_v52 = vpack.c.bf16 %v1624_v18, %v1623_v30 }
 0x316   : > { %1800 = vmatmul.mubr.bf16.gmra.mrb[44].mxu1 %v1628_v52 }
 0x3d1   : > { %v1771_v56 = vpop.f32.mrb[32].mxu1 }
 0x3d2   : > { %v1772_v36 = vadd.f32 %v1771_v56, %v1650_v41  ;;  %v1773_v40 = vpop.f32.mrb[33].mxu1 }
 0x3d3   : > { %v1774_v24 = vadd.f32 %v1773_v40, %v1654_v59  ;;  %v1775_v61 = vpop.f32.mrb[34].mxu1 }
 0x3d4   : > { %v1810_v39 = vmax.f32 %v1772_v36, 0.0  ;;  %v1776_v42 = vadd.f32 %v1775_v61, %v1650_v41  ;;  %v1777_v47 = vpop.f32.mrb[35].mxu1 }
 0x3d5   : > { %v1811_v48 = vmax.f32 %v1774_v24, 0.0  ;;  %v1778_v16 = vadd.f32 %v1777_v47, %v1654_v59 }
 0x3d6   : > { %v1812_v28 = vmax.f32 %v1776_v42, 0.0 }
 0x3d7   : > { %v2083_v29 = vpack.c.bf16 %v1811_v48, %v1810_v39  ;;  %v1813_v31 = vmax.f32 %v1778_v16, 0.0 }
 0x3d9   : > { %1874 = vst [vmem:[%s3030_s29] sm:$0xff] %v2083_v29  ;;  %v2084_v38 = vpack.c.bf16 %v1813_v31, %v1812_v28  ;;  %v1781_v60 = vpop.f32.mrb[36].mxu1 }
 0x3da   : > { %v1782_v1 = vadd.f32 %v1781_v60, %v1650_v41  ;;  %v1783_v51 = vpop.f32.mrb[37].mxu1 }
 0x3db   : > { %1875 = vst [vmem:[%s3030_s29 + $0x8] sm:$0xff] %v2084_v38  ;;  %v1784_v53 = vadd.f32 %v1783_v51, %v1654_v59  ;;  %v1785_v54 = vpop.f32.mrb[38].mxu1 }
 0x3dc   : > { %v1814_v26 = vmax.f32 %v1782_v1, 0.0  ;;  %v1786_v55 = vadd.f32 %v1785_v54, %v1650_v41  ;;  %v1787_v46 = vpop.f32.mrb[39].mxu1 }
 0x3dd   : > { %v1815_v57 = vmax.f32 %v1784_v53, 0.0  ;;  %v1788_v58 = vadd.f32 %v1787_v46, %v1654_v59 }
 0x3de   : > { %v1816_v63 = vmax.f32 %v1786_v55, 0.0 }
 0x3df   : > { %v2085_v37 = vpack.c.bf16 %v1815_v57, %v1814_v26  ;;  %v1817_v0 = vmax.f32 %v1788_v58, 0.0 }
 0x3e1   : > { %1876 = vst [vmem:[%s3030_s29 + $0x10] sm:$0xff] %v2085_v37  ;;  %v2086_v3 = vpack.c.bf16 %v1817_v0, %v1816_v63  ;;  %v1791_v5 = vpop.f32.mrb[40].mxu1 }
 0x3e2   : > { %v1792_v44 = vadd.f32 %v1791_v5, %v1650_v41  ;;  %v1793_v6 = vpop.f32.mrb[41].mxu1 }
 0x3e3   : > { %1877 = vst [vmem:[%s3030_s29 + $0x18] sm:$0xff] %v2086_v3  ;;  %v1794_v8 = vadd.f32 %v1793_v6, %v1654_v59  ;;  %v1795_v32 = vpop.f32.mrb[42].mxu1 }
 0x3e4   : > { %v1818_v9 = vmax.f32 %v1792_v44, 0.0  ;;  %v1796_v10 = vadd.f32 %v1795_v32, %v1650_v41  ;;  %v1797_v33 = vpop.f32.mrb[43].mxu1 }
 0x3e5   : > { %v1819_v2 = vmax.f32 %v1794_v8, 0.0  ;;  %v1798_v12 = vadd.f32 %v1797_v33, %v1654_v59 }
 0x3e6   : > { %v1820_v11 = vmax.f32 %v1796_v10, 0.0 }
 0x3e7   : > { %v2087_v35 = vpack.c.bf16 %v1819_v2, %v1818_v9  ;;  %v1821_v13 = vmax.f32 %v1798_v12, 0.0 }
 0x3e9   : > { %1878 = vst [vmem:[%s3030_s29 + $0x20] sm:$0xff] %v2087_v35  ;;  %v2088_v4 = vpack.c.bf16 %v1821_v13, %v1820_v11  ;;  %v1801_v62 = vpop.f32.mrb[44].mxu1 }
 0x3ea   : > { %v1802_v7 = vadd.f32 %v1801_v62, %v1650_v41  ;;  %v1803_v34 = vpop.f32.mrb[45].mxu1 }
 0x3eb   : > { %1879 = vst [vmem:[%s3030_s29 + $0x28] sm:$0xff] %v2088_v4  ;;  %v1804_v14 = vadd.f32 %v1803_v34, %v1654_v59  ;;  %v1805_v43 = vpop.f32.mrb[46].mxu1 }
 0x3ec   : > { %v1822_v15 = vmax.f32 %v1802_v7, 0.0  ;;  %v1806_v17 = vadd.f32 %v1805_v43, %v1650_v41  ;;  %v1807_v19 = vpop.f32.mrb[47].mxu1 }
 0x3ed   : > { %v1823_v45 = vmax.f32 %v1804_v14, 0.0  ;;  %v1808_v20 = vadd.f32 %v1807_v19, %v1654_v59 }
 0x3ee   : > { %v1824_v21 = vmax.f32 %v1806_v17, 0.0 }
 0x3ef   : > { %v2089_v22 = vpack.c.bf16 %v1823_v45, %v1822_v15  ;;  %v1825_v23 = vmax.f32 %v1808_v20, 0.0 }
 0x3f1   : > { %1880 = vst [vmem:[%s3030_s29 + $0x30] sm:$0xff] %v2089_v22  ;;  %v2090_v25 = vpack.c.bf16 %v1825_v23, %v1824_v21 }
 0x3f3   : > { %1881 = vst [vmem:[%s3030_s29 + $0x38] sm:$0xff] %v2090_v25 }
 0x3f4 PF: > { %s19_s30 = sadd.s32 1, %s2447_s30  }
 0x3f5   : > { %p16_p4 = scmp.ge.s32.totalorder %s19_s30, 4  }
 0x3f7   :  { %18 = sbr.rel (!%p16_p4) target bundleno = 1 (0x1), region = 86 }

</bundles_post_ra>
